<compile_context>
chip_gen: v5e
topology: v5e:2x2
jax: 0.10.0
libtpu: 0.0.40
codegen_flags: <defaults>
</compile_context>

<pallas_src>
import jax
import jax.numpy as jnp
from jax.experimental import pallas as pl
from jax.experimental.pallas import tpu as pltpu


def _round_up(x, m):
    return ((x + m - 1) // m) * m


def _pad2(a, rows, cols):
    pr, pc = rows - a.shape[0], cols - a.shape[1]
    if pr == 0 and pc == 0:
        return a
    return jnp.pad(a, ((0, pr), (0, pc)))


def _pick_tile(dim, max_tile):
    """Balanced 128-aligned tile <= max_tile; returns (tile, padded_dim)."""
    dim128 = _round_up(dim, 128)
    tile = min(_round_up(max_tile, 128), dim128)
    n_tiles = -(-dim128 // tile)
    tile = _round_up(-(-dim128 // n_tiles), 128)
    return tile, n_tiles * tile


def _vmem_budget():
    """Usable scoped-VMEM budget: physical VMEM minus a ~16 MiB compiler margin."""
    try:
        cap = pltpu.get_tpu_info().vmem_capacity_bytes
    except Exception:
        cap = 64 * 1024 * 1024          # conservative (v7x-sized) fallback
    return int(max(cap - 16 * 1024 * 1024, 32 * 1024 * 1024))


def ffn_kernel(x_ref, w1_ref, b1_ref, w2_ref, b2_ref, o_ref, acc_ref):
    """One (row tile i, out-col tile j, hidden tile k) grid step.

    acc(i, j) += relu(x_i @ W1[:, k] + b1[k]) @ W2[k, j]; fc2 bias is folded
    into the k==0 accumulator init, writeback at the last k. With tile_n
    covering the full output width (the default) the j axis has extent 1, so
    fc1 is computed exactly once per (i, k).
    """
    k = pl.program_id(2)

    @pl.when(k == 0)
    def _init():
        # fc2 bias folded into the f32 accumulator init (hoisted out of the k loop).
        acc_ref[...] = jnp.broadcast_to(
            b2_ref[...].astype(jnp.float32), acc_ref.shape)

    # fc1 chunk: bf16 MXU inputs, f32 accumulation; bias + ReLU on the VPU in f32.
    h = jnp.dot(x_ref[...], w1_ref[...], preferred_element_type=jnp.float32)
    h = jnp.maximum(h + b1_ref[...].astype(jnp.float32), 0.0)   # act='relu'
    # TODO(synk): layer_norm=False and dropout p=0.0 (eval) are identities; omitted.

    # fc2 chunk accumulate: (tile_m, tile_k) @ (tile_k, tile_n) -> f32 accumulator.
    acc_ref[...] += jnp.dot(h.astype(jnp.bfloat16), w2_ref[...],
                            preferred_element_type=jnp.float32)

    @pl.when(k == pl.num_programs(2) - 1)
    def _finalize():
        o_ref[...] = acc_ref[...].astype(o_ref.dtype)


def transformer_ffn(x1, x2, w1, b1, w2, b2, *, tile_m=None, tile_k=512, tile_n=None):
    """x1, x2: (N, dim1); w1: (dim1, dim3); b1: (dim3,); w2: (dim3, dim4); b2: (dim4,).

    Weights are pre-transposed vs the PyTorch Linear layout (fc.weight.T).
    tile_n=None means "cover the full (128-padded) output width if VMEM allows"
    (single j tile -> no fc1 recompute). Zero padding contributes exactly zero
    through both matmuls and is sliced away from the result.
    """
    N, dim1 = x1.shape
    dim3 = w1.shape[1]
    dim4 = w2.shape[1]
    out_dtype = x1.dtype
    out_bytes = jnp.dtype(out_dtype).itemsize

    dim1_p = _round_up(dim1, 128)
    budget = _vmem_budget()

    # Larger row tiles on the 128 MiB parts (v5e/v6e); 256 on v7x's 64 MiB.
    if tile_m is None:
        tile_m = 512 if budget >= 96 * 1024 * 1024 else 256
    tile_m = max(8, min(tile_m, _round_up(N, 8)))

    tk_cap = tile_k
    tn_cap = tile_n            # None => single output tile (preferred)

    # Shrink order: tile_k (no extra HBM traffic) -> tile_m -> tile_n (last,
    # since splitting the output width reintroduces fc1 recompute).
    while True:
        tile_k_, d3_p = _pick_tile(dim3, tk_cap)
        tile_n_, d4_p = _pick_tile(dim4, tn_cap if tn_cap is not None else dim4)
        est = (2 * tile_m * dim1_p * 2            # x tile (bf16, double-buffered)
               + 2 * dim1_p * tile_k_ * 2         # W1 block (bf16, double-buffered)
               + 2 * tile_k_ * tile_n_ * 2        # W2 block (bf16, double-buffered)
               + 2 * (tile_k_ + tile_n_) * 4      # bias chunks
               + 2 * tile_m * tile_n_ * out_bytes # output tile (double-buffered)
               + tile_m * tile_n_ * 4             # f32 accumulator scratch
               + tile_m * tile_k_ * 4)            # fc1 intermediate headroom
        if est <= budget:
            break
        if tk_cap > 256:
            tk_cap //= 2
        elif tile_m > 128:
            tile_m = max(128, tile_m // 2)
        elif tn_cap is None:
            tn_cap = max(512, _round_up(dim4, 128) // 2)
        elif tn_cap > 512:
            tn_cap //= 2
        else:
            break
    tile_k, tile_n = tile_k_, tile_n_
    n_p = _round_up(N, tile_m)

    # x1 + x2 once, in f32, as a single XLA op; the kernel gets ONE bf16 tensor
    # (the MXU consumes bf16 anyway; f32 inputs would only double DMA/VMEM).
    x = x1.astype(jnp.float32) + x2.astype(jnp.float32)
    x_p = _pad2(x, n_p, dim1_p).astype(jnp.bfloat16)
    w1_p = _pad2(w1, dim1_p, d3_p).astype(jnp.bfloat16)
    w2_p = _pad2(w2, d3_p, d4_p).astype(jnp.bfloat16)
    b1_p = _pad2(b1.reshape(1, dim3).astype(jnp.float32), 1, d3_p)
    b2_p = _pad2(b2.reshape(1, dim4).astype(jnp.float32), 1, d4_p)

    # Note (v7x): for realistic token counts n_p//tile_m >= 2, so the parallel
    # row axis still feeds both TensorCores even when d4_p//tile_n == 1.
    grid = (n_p // tile_m, d4_p // tile_n, d3_p // tile_k)

    vmem_limit = int(min(max(est * 5 // 4, 32 * 1024 * 1024), budget))

    out_p = pl.pallas_call(
        ffn_kernel,
        out_shape=jax.ShapeDtypeStruct((n_p, d4_p), out_dtype),
        grid_spec=pltpu.PrefetchScalarGridSpec(
            num_scalar_prefetch=0,
            grid=grid,
            in_specs=[
                pl.BlockSpec((tile_m, dim1_p), lambda i, j, k: (i, 0)),   # x tile
                pl.BlockSpec((dim1_p, tile_k), lambda i, j, k: (0, k)),   # W1 block
                pl.BlockSpec((1, tile_k),      lambda i, j, k: (0, k)),   # b1 chunk
                pl.BlockSpec((tile_k, tile_n), lambda i, j, k: (k, j)),   # W2 block
                pl.BlockSpec((1, tile_n),      lambda i, j, k: (0, j)),   # b2 chunk
            ],
            out_specs=pl.BlockSpec((tile_m, tile_n), lambda i, j, k: (i, j)),
            scratch_shapes=[pltpu.VMEM((tile_m, tile_n), jnp.float32)],
        ),
        compiler_params=pltpu.CompilerParams(
            dimension_semantics=("parallel", "parallel", "arbitrary"),
            vmem_limit_bytes=vmem_limit,
        ),
    )(x_p, w1_p, b1_p, w2_p, b2_p)

    return out_p[:N, :dim4]


def xavier_normal(key, fan_in, fan_out, dtype=jnp.float32):
    std = (2.0 / (fan_in + fan_out)) ** 0.5
    return std * jax.random.normal(key, (fan_in, fan_out), dtype=dtype)


if __name__ == "__main__":
    # Module dims: dim1 (input), dim3 (hidden), dim4 (output). dim2 unused by forward.
    batch, seq = 2, 8
    dim1, dim3, dim4 = 32, 64, 32

    key = jax.random.PRNGKey(0)
    k_x1, k_x2, k_w1, k_b1, k_w2, k_b2 = jax.random.split(key, 6)

    x1 = jax.random.normal(k_x1, (batch, seq, dim1), dtype=jnp.float32)
    x2 = jax.random.normal(k_x2, (batch, seq, dim1), dtype=jnp.float32)

    # Deterministic parameter init (xavier_normal on weights, like the module).
    w1 = xavier_normal(k_w1, dim1, dim3)                  # (dim1, dim3) == fc1.weight.T
    b1 = 0.01 * jax.random.normal(k_b1, (dim3,), dtype=jnp.float32)
    w2 = xavier_normal(k_w2, dim3, dim4)                  # (dim3, dim4) == fc2.weight.T
    b2 = 0.01 * jax.random.normal(k_b2, (dim4,), dtype=jnp.float32)

    # Glue: flatten (batch, seq) -> tokens for the kernel, restore after.
    x1_flat = x1.reshape(batch * seq, dim1)
    x2_flat = x2.reshape(batch * seq, dim1)

    out_flat = transformer_ffn(x1_flat, x2_flat, w1, b1, w2, b2)
    out = out_flat.reshape(batch, seq, dim4)
    jax.block_until_ready(out)

    # Reference check in plain f32 JAX (same semantics as the PyTorch forward with
    # layer_norm=False, act='relu', dropout=0.0 in eval mode). bf16 MXU inputs ->
    # loosened tolerance vs the f32 reference.
    x = x1 + x2
    ref = jnp.maximum(x @ w1 + b1, 0.0) @ w2 + b2
    assert jnp.allclose(out, ref, atol=5e-2, rtol=5e-2), "mismatch vs reference"

    print("KERNEL_OK")
</pallas_src>

<mosaic_0001>
module attributes {stable_mosaic.version = 11 : i64} {
  func.func @ffn_kernel(%arg0: i32, %arg1: i32, %arg2: i32, %arg3: memref<16x128xbf16, #tpu.memory_space<vmem>>, %arg4: memref<128x128xbf16, #tpu.memory_space<vmem>>, %arg5: memref<1x128xf32, #tpu.memory_space<vmem>>, %arg6: memref<128x128xbf16, #tpu.memory_space<vmem>>, %arg7: memref<1x128xf32, #tpu.memory_space<vmem>>, %arg8: memref<16x128xf32, #tpu.memory_space<vmem>>, %arg9: memref<16x128xf32, #tpu.memory_space<vmem>>) attributes {dimension_semantics = [#tpu.dimension_semantics<parallel>, #tpu.dimension_semantics<parallel>, #tpu.dimension_semantics<arbitrary>], iteration_bounds = array<i64: 1, 1, 1>, scalar_prefetch = 0 : i64, scratch_operands = 1 : i64, tpu.core_type = #tpu.core_type<tc>, window_params = [{transform_indices = @transform_0, window_bounds = array<i64: 16, 128>}, {transform_indices = @transform_1, window_bounds = array<i64: 128, 128>}, {transform_indices = @transform_2, window_bounds = array<i64: 1, 128>}, {transform_indices = @transform_3, window_bounds = array<i64: 128, 128>}, {transform_indices = @transform_4, window_bounds = array<i64: 1, 128>}, {transform_indices = @transform_5, window_bounds = array<i64: 16, 128>}]} {
    %c0_i32 = arith.constant 0 : i32
    %0 = arith.cmpi eq, %arg2, %c0_i32 : i32
    %1 = arith.extui %0 : i1 to i32
    %c0_i32_0 = arith.constant 0 : i32
    %2 = arith.cmpi ne, %1, %c0_i32_0 : i32
    scf.if %2 {
      %c0_16 = arith.constant 0 : index
      %c0_17 = arith.constant 0 : index
      %20 = vector.load %arg7[%c0_16, %c0_17] : memref<1x128xf32, #tpu.memory_space<vmem>>, vector<1x128xf32>
      %21 = vector.shape_cast %20 : vector<1x128xf32> to vector<1x128xf32>
      %22 = vector.broadcast %21 : vector<1x128xf32> to vector<16x128xf32>
      %c0_18 = arith.constant 0 : index
      %c0_19 = arith.constant 0 : index
      %23 = vector.load %arg9[%c0_18, %c0_19] : memref<16x128xf32, #tpu.memory_space<vmem>>, vector<16x128xf32>
      tpu.vector_store %arg9[%c0_18, %c0_19], %22 {strides = array<i32>} : memref<16x128xf32, #tpu.memory_space<vmem>>, vector<16x128xf32>,
    } else {
    }
    %c0 = arith.constant 0 : index
    %c0_1 = arith.constant 0 : index
    %3 = vector.load %arg3[%c0, %c0_1] : memref<16x128xbf16, #tpu.memory_space<vmem>>, vector<16x128xbf16>
    %c0_2 = arith.constant 0 : index
    %c0_3 = arith.constant 0 : index
    %4 = vector.load %arg4[%c0_2, %c0_3] : memref<128x128xbf16, #tpu.memory_space<vmem>>, vector<128x128xbf16>
    %cst = arith.constant dense<0.000000e+00> : vector<16x128xf32>
    %5 = tpu.matmul %3, %4, %cst {dimension_numbers = #tpu.dot_dimension_numbers<[1], [0], [0], [1], [0, 0, 1, 1], [], []>} : vector<16x128xbf16>, vector<128x128xbf16>, vector<16x128xf32> -> vector<16x128xf32>
    %c0_4 = arith.constant 0 : index
    %c0_5 = arith.constant 0 : index
    %6 = vector.load %arg5[%c0_4, %c0_5] : memref<1x128xf32, #tpu.memory_space<vmem>>, vector<1x128xf32>
    %7 = vector.broadcast %6 : vector<1x128xf32> to vector<16x128xf32>
    %8 = arith.addf %5, %7 : vector<16x128xf32>
    %cst_6 = arith.constant 0.000000e+00 : f32
    %9 = vector.broadcast %cst_6 : f32 to vector<16x128xf32>
    %10 = arith.maximumf %8, %9 : vector<16x128xf32>
    %c0_7 = arith.constant 0 : index
    %c0_8 = arith.constant 0 : index
    %11 = vector.load %arg9[%c0_7, %c0_8] : memref<16x128xf32, #tpu.memory_space<vmem>>, vector<16x128xf32>
    %12 = arith.truncf %10 : vector<16x128xf32> to vector<16x128xbf16>
    %c0_9 = arith.constant 0 : index
    %c0_10 = arith.constant 0 : index
    %13 = vector.load %arg6[%c0_9, %c0_10] : memref<128x128xbf16, #tpu.memory_space<vmem>>, vector<128x128xbf16>
    %cst_11 = arith.constant dense<0.000000e+00> : vector<16x128xf32>
    %14 = tpu.matmul %12, %13, %cst_11 {dimension_numbers = #tpu.dot_dimension_numbers<[1], [0], [0], [1], [0, 0, 1, 1], [], []>} : vector<16x128xbf16>, vector<128x128xbf16>, vector<16x128xf32> -> vector<16x128xf32>
    %15 = arith.addf %11, %14 : vector<16x128xf32>
    %c0_12 = arith.constant 0 : index
    %c0_13 = arith.constant 0 : index
    %16 = vector.load %arg9[%c0_12, %c0_13] : memref<16x128xf32, #tpu.memory_space<vmem>>, vector<16x128xf32>
    tpu.vector_store %arg9[%c0_12, %c0_13], %15 {strides = array<i32>} : memref<16x128xf32, #tpu.memory_space<vmem>>, vector<16x128xf32>,
    %c0_i32_14 = arith.constant 0 : i32
    %17 = arith.cmpi eq, %arg2, %c0_i32_14 : i32
    %18 = arith.extui %17 : i1 to i32
    %c0_i32_15 = arith.constant 0 : i32
    %19 = arith.cmpi ne, %18, %c0_i32_15 : i32
    scf.if %19 {
      %c0_16 = arith.constant 0 : index
      %c0_17 = arith.constant 0 : index
      %20 = vector.load %arg9[%c0_16, %c0_17] : memref<16x128xf32, #tpu.memory_space<vmem>>, vector<16x128xf32>
      %c0_18 = arith.constant 0 : index
      %c0_19 = arith.constant 0 : index
      %21 = vector.load %arg8[%c0_18, %c0_19] : memref<16x128xf32, #tpu.memory_space<vmem>>, vector<16x128xf32>
      tpu.vector_store %arg8[%c0_18, %c0_19], %20 {strides = array<i32>} : memref<16x128xf32, #tpu.memory_space<vmem>>, vector<16x128xf32>,
    } else {
    }
    return
  }
  func.func @transform_0(%arg0: i32, %arg1: i32, %arg2: i32) -> (i32, i32) {
    %c0_i32 = arith.constant 0 : i32
    %c0_i32_0 = arith.constant 0 : i32
    return %arg0, %c0_i32 : i32, i32
  }
  func.func @transform_1(%arg0: i32, %arg1: i32, %arg2: i32) -> (i32, i32) {
    %c0_i32 = arith.constant 0 : i32
    %c0_i32_0 = arith.constant 0 : i32
    return %c0_i32, %arg2 : i32, i32
  }
  func.func @transform_2(%arg0: i32, %arg1: i32, %arg2: i32) -> (i32, i32) {
    %c0_i32 = arith.constant 0 : i32
    %c0_i32_0 = arith.constant 0 : i32
    return %c0_i32, %arg2 : i32, i32
  }
  func.func @transform_3(%arg0: i32, %arg1: i32, %arg2: i32) -> (i32, i32) {
    %c0_i32 = arith.constant 0 : i32
    return %arg2, %arg1 : i32, i32
  }
  func.func @transform_4(%arg0: i32, %arg1: i32, %arg2: i32) -> (i32, i32) {
    %c0_i32 = arith.constant 0 : i32
    %c0_i32_0 = arith.constant 0 : i32
    return %c0_i32, %arg1 : i32, i32
  }
  func.func @transform_5(%arg0: i32, %arg1: i32, %arg2: i32) -> (i32, i32) {
    %c0_i32 = arith.constant 0 : i32
    return %arg0, %arg1 : i32, i32
  }
}

</mosaic_0001>

<bundles_post_ra>
// kernel: tpu_custom_call.1
= control target key start
LH: loop header
LB: loop body
LE: loop exit
PB: predicated region body
PF: predicated region fallthrough
CT: control target
= control target key end

     0   :  { %10 = vsyncpa [#allocation4], 0  ;;  %s535_s0 = inlined_call_operand.hbm [shape: bf16[16,128], index: 0, kind: input, shape index: {}]   ;;  %s536_s1 = inlined_call_operand.hbm [shape: bf16[128,128], index: 1, kind: input, shape index: {}]   ;;  %s537_s2 = inlined_call_operand.vmem [shape: f32[1,128], index: 2, kind: input, shape index: {}]   ;;  %s538_s3 = inlined_call_operand.hbm [shape: bf16[128,128], index: 3, kind: input, shape index: {}]   ;;  %s539_s4 = inlined_call_operand.vmem [shape: f32[1,128], index: 4, kind: input, shape index: {}]   ;;  %s540_s5 = inlined_call_operand.hbm [shape: f32[16,128], index: 5, kind: output, shape index: {}]  }
   0x1   :  { %11 = vsyncpa [#allocation7], 0 }
   0x2   :  { %12 = vsyncpa [#allocation5], 0  ;;  %s30_s20 = sshll.u32 %s536_s1, 4  ;;  %s479_s21 = smov [#allocation6]   ;;  %s31_s20 = int_to_ptr.hbm [resolvable:$true] %s30_s20 }
   0x3   :  { %s32_s22 = sshll.u32 %s479_s21, 4  ;;  %s17_s25 = sshll.u32 %s535_s0, 4  ;;  %s33_s22 = int_to_ptr.vmem [resolvable:$true] %s32_s22  ;;  %s18_s25 = int_to_ptr.hbm [resolvable:$true] %s17_s25 }
   0x4   :  { %s480_s26 = smov 64   ;;  %s481_s27 = smov 4  }
   0x5   :  { %38 = dma.hbm_to_vmem [thread:$0]  %s31_s20, 1024, %s33_s22, [#allocation7], %s480_s26, %s480_s26, %s481_s27  }
   0x6   :  { %s482_s28 = smov [#allocation3]   ;;  %s45_s7 = sshll.u32 %s538_s3, 4  ;;  %s46_s7 = int_to_ptr.hbm [resolvable:$true] %s45_s7 }
   0x7   :  { %s19_s29 = sshll.u32 %s482_s28, 4  ;;  %s483_s1 = smov [#allocation8]   ;;  %s20_s29 = int_to_ptr.vmem [resolvable:$true] %s19_s29 }
   0x8   :  { %25 = dma.hbm_to_vmem [thread:$0]  %s18_s25, 128, %s20_s29, [#allocation4], %s480_s26, %s480_s26, %s481_s27  }
   0x9   :  { %s47_s8 = sshll.u32 %s483_s1, 4  ;;  %s48_s8 = int_to_ptr.vmem [resolvable:$true] %s47_s8 }
   0xa   :  { %53 = dma.hbm_to_vmem [thread:$0]  %s46_s7, 1024, %s48_s8, [#allocation7], %s480_s26, %s480_s26, %s481_s27  }
   0xb   :  { %473 = dma.done.wait [#allocation4], 128  }
   0xc   :  { %474 = vsyncadd [#allocation4], 4294967168 }
   0xd   :  { %475 = dma.done.wait [#allocation7], 2048  }
   0xe   :  { %476 = vsyncadd [#allocation7], 4294965248  ;;  %v358_v0 = vld [vmem:[#allocation6 + $0x38] sm:$0xff]  ;;  %v357_v1 = vld [vmem:[#allocation6 + $0x30] sm:$0xff]  ;;  %s484_s11 = smov [#allocation9]   ;;  %s485_s15 = smov 128  }
   0xf   :  { %154 = vmatpush.bf16.msra.mxu0 %v358_v0  ;;  %v366_v2 = vld [vmem:[#allocation8 + $0x38] sm:$0xff]  ;;  %v365_v3 = vld [vmem:[#allocation8 + $0x30] sm:$0xff]  ;;  %v356_v4 = vld [vmem:[#allocation6 + $0x28] sm:$0xff]  ;;  %s266_s12 = sshll.u32 %s484_s11, 4  ;;  %s486_s16 = smov 8   ;;  %s267_s12 = int_to_ptr.vmem [resolvable:$true] %s266_s12 }
  0x10   :  { %237 = vmatpush.bf16.msra.mxu1 %v366_v2  ;;  %v364_v5 = vld [vmem:[#allocation8 + $0x28] sm:$0xff]  ;;  %v355_v6 = vld [vmem:[#allocation6 + $0x20] sm:$0xff]  ;;  %v354_v8 = vld [vmem:[#allocation6 + $0x18] sm:$0xff] }
  0x11   :  { %v363_v7 = vld [vmem:[#allocation8 + $0x20] sm:$0xff]  ;;  %v353_v9 = vld [vmem:[#allocation6 + $0x10] sm:$0xff]  ;;  %v352_v10 = vld [vmem:[#allocation6 + $0x8] sm:$0xff] }
  0x12   :  { %v351_v11 = vld [vmem:[#allocation6] sm:$0xff]  ;;  %v350_v12 = vld [vmem:[#allocation3] sm:$0xff]  ;;  %v361_v14 = vld [vmem:[#allocation8 + $0x10] sm:$0xff] }
  0x13   :  { %155 = vmatpush.bf16.msra.mxu0 %v357_v1  ;;  %v362_v13 = vld [vmem:[#allocation8 + $0x18] sm:$0xff]  ;;  %v360_v15 = vld [vmem:[#allocation8 + $0x8] sm:$0xff]  ;;  %v359_v16 = vld [vmem:[#allocation8] sm:$0xff] }
  0x14   :  { %238 = vmatpush.bf16.msra.mxu1 %v365_v3  ;;  %v375_v18 = vld [vmem:[%s537_s2] ss:$0 sm:$0xff]  ;;  %s268_s2 = sshll.u32 %s540_s5, 4  ;;  %s269_s2 = int_to_ptr.hbm [resolvable:$true] %s268_s2 }
  0x15   :  { %v376_v25 = vld [vmem:[%s539_s4] ss:$0 sm:$0xff] }
  0x17   :  { %156 = vmatpush.bf16.msra.mxu0 %v356_v4 }
  0x18   :  { %239 = vmatpush.bf16.msra.mxu1 %v364_v5 }
  0x1b   :  { %157 = vmatpush.bf16.msra.mxu0 %v355_v6 }
  0x1c   :  { %240 = vmatpush.bf16.msra.mxu1 %v363_v7 }
  0x1f   :  { %158 = vmatpush.bf16.msra.mxu0 %v354_v8 }
  0x20   :  { %241 = vmatpush.bf16.msra.mxu1 %v362_v13 }
  0x23   :  { %159 = vmatpush.bf16.msra.mxu0 %v353_v9 }
  0x24   :  { %242 = vmatpush.bf16.msra.mxu1 %v361_v14 }
  0x27   :  { %160 = vmatpush.bf16.msra.mxu0 %v352_v10 }
  0x28   :  { %243 = vmatpush.bf16.msra.mxu1 %v360_v15 }
  0x2b   :  { %161 = vmatpush.bf16.msra.mxu0 %v351_v11 }
  0x2c   :  { %244 = vmatpush.bf16.msra.mxu1 %v359_v16 }
  0x2e   :  { %162 = vmatmul.bf16.vlgmr.msra.gmra.mxu0 %v350_v12 }
  0xab   :  { %v163_v17 = vpop.f32.mrf.mxu0 }
  0xac   :  { %v164_v19 = vadd.f32 %v375_v18, %v163_v17 }
  0xae   :  { %v168_v22 = vmax.f32 %v164_v19, 0.0 }
  0xb3   :  { %v165_v20 = vpop.f32.mrf.mxu0 }
  0xb4   :  { %v166_v21 = vadd.f32 %v375_v18, %v165_v20 }
  0xb6   :  { %v169_v23 = vmax.f32 %v166_v21, 0.0 }
  0xb8   :  { %v172_v24 = vpack.c.bf16 %v169_v23, %v168_v22 }
  0xba   :  { %245 = vmatmul.bf16.vlgmr.msra.gmra.mxu1 %v172_v24 }
 0x137   :  { %v246_v26 = vpop.f32.mrf.mxu1 }
 0x138   :  { %v251_v27 = vadd.f32 %v376_v25, %v246_v26 }
 0x13a   :  { %260 = vst [vmem:[#allocation9] sm:$0xff] %v251_v27 }
 0x13f   :  { %v248_v28 = vpop.f32.mrf.mxu1 }
 0x140   :  { %v252_v29 = vadd.f32 %v376_v25, %v248_v28 }
 0x142   :  { %261 = vst [vmem:[#allocation9 + $0x8] sm:$0xff] %v252_v29 }
 0x143   :  { %274 = dma.vmem_to_hbm [thread:$0]  %s267_s12, 256, %s269_s2, [#allocation5], %s485_s15, %s485_s15, %s486_s16  }
 0x144   :  { %477 = dma.done.wait [#allocation5], 256  }
 0x145   :  { %478 = vsyncadd [#allocation5], 4294967040 }
 0x146   :  { %279 = vsyncpa [#allocation4], 1 }
 0x147   :  { %280 = vsyncpa [#allocation7], 1 }
 0x148   :  { %281 = vsyncpa [#allocation5], 1 }

</bundles_post_ra>
